<compile_context>
chip_gen: v7x
topology: tpu7x:2x2x1
jax: 0.10.0
libtpu: 0.0.40
codegen_flags: <defaults>
</compile_context>

<pallas_src>
import jax
import jax.numpy as jnp
from jax.experimental import pallas as pl
from jax.experimental.pallas import tpu as pltpu

NUM_CLASSES = 10
C = NUM_CLASSES + 1      # 10 real classes + 1 fake
TILE_ROWS = 8192         # batch rows per grid step (multiple of 128)


def _round_up(x: int, m: int) -> int:
    return ((x + m - 1) // m) * m


def _gan_logits_kernel(x_ref, o_ref):
    # x_ref: (tb, C) row-major tile; o_ref: (1, tb) lane-dense output tile.
    x = x_ref[...].astype(jnp.float32)
    real = x[:, :NUM_CLASSES]                                  # (tb, 10)
    fake = x[:, NUM_CLASSES:]                                  # (tb, 1)

    # Numerically-stable logsumexp over the class (lane) axis, per row.
    m = jnp.max(real, axis=1, keepdims=True)                   # (tb, 1)
    lse = jnp.log(jnp.sum(jnp.exp(real - m), axis=1, keepdims=True)) + m

    # Transpose only the reduced per-row column to a lane-dense (1, tb) block
    # so the HBM writeback uses full, unmasked lane-dense stores.
    o_ref[...] = (lse - fake).T.astype(o_ref.dtype)


def gan_logits(class_logits: jax.Array, *, tile_rows: int = TILE_ROWS) -> jax.Array:
    """class_logits: [B, NUM_CLASSES + 1] -> gan_logits: [B]"""
    B, c_in = class_logits.shape
    assert c_in == C, f"expected last dim {C}, got {c_in}"
    assert tile_rows % 128 == 0, "tile_rows must be a multiple of 128"

    if B % 8 == 0:
        # Sublane-aligned: tile directly, ragged last block if tile doesn't divide B.
        x, b_pad = class_logits, B
        tb = min(tile_rows, B)
    elif B <= tile_rows:
        # Single full-extent block: no sublane-multiple requirement, no copy.
        x, b_pad, tb = class_logits, B, B
    else:
        # Rare: large batch that isn't a multiple of the 8-row sublane quantum.
        b_pad = _round_up(B, 8)
        x = jnp.pad(class_logits, ((0, b_pad - B), (0, 0)))
        tb = min(tile_rows, b_pad)

    grid = (pl.cdiv(b_pad, tb),)
    itemsize = class_logits.dtype.itemsize

    out = pl.pallas_call(
        _gan_logits_kernel,
        out_shape=jax.ShapeDtypeStruct((1, b_pad), class_logits.dtype),
        grid=grid,
        in_specs=[pl.BlockSpec((tb, C), lambda i: (i, 0))],
        out_specs=pl.BlockSpec((1, tb), lambda i: (0, i)),
        compiler_params=pltpu.CompilerParams(
            dimension_semantics=("parallel",),
        ),
        cost_estimate=pl.CostEstimate(
            flops=32 * b_pad,
            transcendentals=11 * b_pad,
            bytes_accessed=(C + 1) * itemsize * b_pad,
        ),
    )(x)

    gan = out[0]                     # (b_pad,) — free reshape of the (1, b_pad) slab
    return gan if b_pad == B else gan[:B]


def gan_logits_ref(class_logits: jax.Array) -> jax.Array:
    """Pure-JAX reference mirroring the PyTorch forward."""
    real = class_logits[:, :NUM_CLASSES]
    fake = jnp.squeeze(class_logits[:, NUM_CLASSES:], axis=1)
    max_val = jnp.max(real, axis=1, keepdims=True)
    stable = real - max_val
    return (
        jnp.log(jnp.sum(jnp.exp(stable), axis=1))
        + jnp.squeeze(max_val, axis=1)
        - fake
    )


if __name__ == "__main__":
    key = jax.random.PRNGKey(0)

    # Small shape consistent with the module: [B, num_classes + 1].
    B = 8
    class_logits = jax.random.normal(key, (B, C), dtype=jnp.float32) * 3.0
    out = jax.block_until_ready(gan_logits(class_logits))
    ref = gan_logits_ref(class_logits)
    assert out.shape == (B,), out.shape
    assert jnp.allclose(out, ref, atol=1e-5, rtol=1e-5), (out, ref)

    # Non-multiple-of-8 batch: single full-extent block, no padding copy.
    B2 = 300
    class_logits2 = jax.random.normal(jax.random.PRNGKey(1), (B2, C), jnp.float32) * 3.0
    out2 = jax.block_until_ready(gan_logits(class_logits2))
    ref2 = gan_logits_ref(class_logits2)
    assert out2.shape == (B2,), out2.shape
    assert jnp.allclose(out2, ref2, atol=1e-5, rtol=1e-5), (out2, ref2)

    # Multi-step, ragged-last-block grid path (small tile so shapes stay small).
    out3 = jax.block_until_ready(gan_logits(class_logits2, tile_rows=128))
    assert out3.shape == (B2,), out3.shape
    assert jnp.allclose(out3, ref2, atol=1e-5, rtol=1e-5), (out3, ref2)

    print("KERNEL_OK")
</pallas_src>

<mosaic_0001>
module attributes {stable_mosaic.version = 11 : i64} {
  func.func @_gan_logits_kernel(%arg0: i32, %arg1: memref<8x11xf32, #tpu.memory_space<vmem>>, %arg2: memref<1x8xf32, #tpu.memory_space<vmem>>) attributes {dimension_semantics = [#tpu.dimension_semantics<parallel>], iteration_bounds = array<i64: 1>, scalar_prefetch = 0 : i64, scratch_operands = 0 : i64, tpu.core_type = #tpu.core_type<tc>, window_params = [{transform_indices = @transform_0, window_bounds = array<i64: 8, 11>}, {transform_indices = @transform_1, window_bounds = array<i64: 1, 8>}]} {
    %c0 = arith.constant 0 : index
    %c0_0 = arith.constant 0 : index
    %0 = vector.load %arg1[%c0, %c0_0] : memref<8x11xf32, #tpu.memory_space<vmem>>, vector<8x11xf32>
    %1 = vector.extract_strided_slice %0 {offsets = [0, 0], sizes = [8, 10], strides = [1, 1]} : vector<8x11xf32> to vector<8x10xf32>
    %2 = vector.extract_strided_slice %0 {offsets = [0, 10], sizes = [8, 1], strides = [1, 1]} : vector<8x11xf32> to vector<8x1xf32>
    %cst = arith.constant dense<0xFF800000> : vector<8xf32>
    %3 = vector.multi_reduction <maximumf>, %1, %cst [1] : vector<8x10xf32> to vector<8xf32>
    %4 = vector.shape_cast %3 : vector<8xf32> to vector<8x1xf32>
    %5 = vector.broadcast %4 : vector<8x1xf32> to vector<8x10xf32>
    %6 = arith.subf %1, %5 : vector<8x10xf32>
    %7 = math.exp %6 : vector<8x10xf32>
    %cst_1 = arith.constant dense<0.000000e+00> : vector<8xf32>
    %8 = vector.multi_reduction <add>, %7, %cst_1 [1] : vector<8x10xf32> to vector<8xf32>
    %9 = vector.shape_cast %8 : vector<8xf32> to vector<8x1xf32>
    %10 = math.log %9 : vector<8x1xf32>
    %11 = arith.addf %10, %4 : vector<8x1xf32>
    %12 = arith.subf %11, %2 : vector<8x1xf32>
    %13 = tpu.transpose %12, [1, 0] : vector<8x1xf32> -> vector<1x8xf32>
    %c0_2 = arith.constant 0 : index
    %c0_3 = arith.constant 0 : index
    %14 = vector.load %arg2[%c0_2, %c0_3] : memref<1x8xf32, #tpu.memory_space<vmem>>, vector<1x8xf32>
    tpu.vector_store %arg2[%c0_2, %c0_3], %13 {strides = array<i32>} : memref<1x8xf32, #tpu.memory_space<vmem>>, vector<1x8xf32>,
    return
  }
  func.func @transform_0(%arg0: i32) -> (i32, i32) {
    %c0_i32 = arith.constant 0 : i32
    %c0_i32_0 = arith.constant 0 : i32
    return %arg0, %c0_i32 : i32, i32
  }
  func.func @transform_1(%arg0: i32) -> (i32, i32) {
    %c0_i32 = arith.constant 0 : i32
    %c0_i32_0 = arith.constant 0 : i32
    return %c0_i32, %arg0 : i32, i32
  }
}

</mosaic_0001>

<bundles_post_ra>
// kernel: tpu_custom_call.1
= control target key start
LH: loop header
LB: loop body
LE: loop exit
PB: predicated region body
PF: predicated region fallthrough
CT: control target
= control target key end

     0   :  { %6 = vsyncpa [#allocation3], 0  ;;  %s182_s0 = inlined_call_operand.hbm [shape: f32[8,11], index: 0, kind: input, shape index: {}]   ;;  %s183_s1 = inlined_call_operand.hbm [shape: f32[1,8], index: 1, kind: output, shape index: {}]  }
   0x1   :  { %7 = vsyncpa [#allocation4], 0  ;;  %s145_s6 = smov [#allocation2]   ;;  %s97_s10 = scalar_lea.hbm %s182_s0, 128 }
   0x2   :  { %s14_s7 = sshll.u32 %s145_s6, 4  ;;  %p98_p0 = scmp.ne.s32.totalorder %s182_s0, %s97_s10  ;;  %s15_s7 = int_to_ptr.vmem [resolvable:$true] %s14_s7 }
   0x3   :  { %p101_p1 = scmp.lt.u32.totalorder %s97_s10, %s182_s0 }
   0x5   :  { %p103_p2 = pnand %p101_p1, %p98_p0 }
   0x7   :  { %106 = shalt.err (!%p103_p2)
}
   0x8   :  { %s107_s15 = scalar_lea.vmem %s15_s7, 128  ;;  %p112_p4 = scmp.lt.s32.totalorder %s15_s7, %s15_s7 }
   0x9   :  { %p108_p3 = scmp.ne.s32.totalorder %s15_s7, %s107_s15  ;;  %p113_p5 = scmp.lt.s32.totalorder %s107_s15, %s107_s15 }
   0xb   :  { %p114_p6 = por %p113_p5, %p112_p4 }
   0xd   :  { %p115_p7 = pnand %p114_p6, %p108_p3 }
   0xf   :  { %118 = shalt.err (!%p115_p7)
}
  0x10   :  { %17 = dma.hbm_to_vmem [thread:$0]  %s182_s0, 128, %s15_s7, [#allocation3]  }
  0x11   :  { %141 = dma.done.wait [#allocation3], 128  }
  0x12   :  { %142 = vsyncadd [#allocation3], 4294967168  ;;  %vm22_vm0 = vcmask 80896   ;;  %v21_v0 = vld [vmem:[#allocation2] sm:$0xff]  ;;  %s146_s0 = smov 118   ;;  %s147_s18 = smov [#allocation5]  }
  0x13   :  { %v23_v1 = vsel %vm22_vm0, %v21_v0, -inf  ;;  %s80_s19 = sshll.u32 %s147_s18, 4  ;;  %vm72_vm1 = vcmask 57344   ;;  %s81_s19 = int_to_ptr.vmem [resolvable:$true] %s80_s19 }
  0x14   :  { %24 = vmax.xlane.f32.xlu0 %v23_v1  ;;  %s119_s20 = scalar_lea.vmem %s81_s19, 16  ;;  %s123_s21 = scalar_lea.vmem %s81_s19, 32 }
  0x15   :  { %p120_p8 = scmp.ne.s32.totalorder %s81_s19, %s119_s20  ;;  %p124_p9 = scmp.lt.s32.totalorder %s81_s19, %s81_s19 }
  0x16   :  { %p125_p10 = scmp.lt.s32.totalorder %s123_s21, %s119_s20 }
  0x18   :  { %p126_p11 = por %p125_p10, %p124_p9 }
  0x1a   :  { %p127_p12 = pnand %p126_p11, %p120_p8 }
  0xa1   :  { %v25_v2 = vpop.xlane.xlu0 %24 }
  0xa2   :  { %v26_v3 = vsub.f32 %v21_v0, %v25_v2 }
  0xa4   :  { %v27_v4 = vmul.f32 1.442695, %v26_v3 }
  0xa6   :  { %93 = vpow2.f32 %v27_v4 }
  0xb0   :  { %v94_v5 = vpop.eup %93 }
  0xb1   :  { %v29_v6 = vsel %vm22_vm0, %v94_v5, 0.0 }
  0xb2   :  { %30 = vadd.xlane.f32.xlu0 %v29_v6 }
 0x13f   :  { %v31_v7 = vpop.xlane.xlu0 %30 }
 0x140   :  { %95 = vlog2.f32 %v31_v7 }
 0x14a   :  { %v96_v8 = vpop.eup %95 }
 0x14b   :  { %v33_v9 = vmul.f32 0.6931472, %v96_v8 }
 0x14d   :  { %v34_v10 = vadd.f32 %v33_v9, %v25_v2 }
 0x14f   :  { %v35_v11 = vsub.f32 %v34_v10, %v21_v0 }
 0x151   :  { %37 = vrot.lane.b32.xlu1 %v35_v11, %s146_s0 }
 0x1c3   :  { %v38_v12 = vpop.permute.xlu1 %37 }
 0x1c4   :  { %40 = vxpose.xlu1.b32.start.end [1/1] (short) (narrow) %v38_v12, 8 }
 0x244   :  { %v56_v13 = vpop.trf.xlu1 }
 0x245   :  { %73 = vst.msk [vmem:[#allocation5] sm:$0x1] %vm72_vm1, %v56_v13 }
 0x246   :  { %130 = shalt.err (!%p127_p12)
}
 0x247   :  { %s131_s24 = scalar_lea.hbm %s183_s1, 16 }
 0x248   :  { %p132_p13 = scmp.ne.s32.totalorder %s183_s1, %s131_s24  ;;  %p135_p0 = scmp.lt.u32.totalorder %s131_s24, %s183_s1 }
 0x24a   :  { %p137_p1 = pnand %p135_p0, %p132_p13 }
 0x24c   :  { %140 = shalt.err (!%p137_p1)
}
 0x24d   :  { %83 = dma.vmem_to_hbm [thread:$0]  %s81_s19, 16, %s183_s1, [#allocation4]  }
 0x24e   :  { %143 = dma.done.wait [#allocation4], 16  }
 0x24f   :  { %144 = vsyncadd [#allocation4], 4294967280 }
 0x250   :  { %87 = vsyncpa [#allocation3], 1 }
 0x251   :  { %88 = vsyncpa [#allocation4], 1 }

</bundles_post_ra>
